<compile_context>
chip_gen: v6e
topology: v6e:2x2x1
jax: 0.10.0
libtpu: 0.0.40
codegen_flags: <defaults>
</compile_context>

<pallas_src>
import functools

import jax
import jax.numpy as jnp
from jax import lax
from jax.experimental import pallas as pl
from jax.experimental.pallas import tpu as pltpu


def _prep_kernel(zi_ref, zj_ref, zis_ref, zjs_ref, pos_ref, *, inv_sqrt_t, eps):
    """Normalize rows (clamped at eps), fold 1/sqrt(T) in, emit positives (= sim/T)."""
    zi = zi_ref[...].astype(jnp.float32)
    zj = zj_ref[...].astype(jnp.float32)
    # 1 / max(||z||, eps) per row, times 1/sqrt(T).
    si = inv_sqrt_t * lax.rsqrt(
        jnp.maximum(jnp.sum(zi * zi, axis=-1, keepdims=True), eps * eps))
    sj = inv_sqrt_t * lax.rsqrt(
        jnp.maximum(jnp.sum(zj * zj, axis=-1, keepdims=True), eps * eps))
    zi_s = zi * si
    zj_s = zj * sj
    pos_ref[...] = jnp.sum(zi_s * zj_s, axis=-1, keepdims=True)  # cos(z_i, z_j)/T
    zis_ref[...] = zi_s.astype(zis_ref.dtype)
    zjs_ref[...] = zj_s.astype(zjs_ref.dtype)


def _ntxent_tiled_kernel(zr_ref, zc_ref, pos_ref, out_ref, denom_ref):
    c = pl.program_id(1)

    @pl.when(c == 0)
    def _():
        denom_ref[...] = jnp.zeros_like(denom_ref)

    # (TR, D) x (TC, D)^T on the MXU; operands are already normalized and scaled
    # by 1/sqrt(T), so this IS sim/T -- no divide, no norm outer-product matmul.
    sim = lax.dot_general(
        zr_ref[...], zc_ref[...], (((1,), (1,)), ((), ())),
        preferred_element_type=jnp.float32,
    )
    # Incremental per-row denominator (only (TR,1) state stays live).
    denom_ref[...] += jnp.sum(jnp.exp(sim), axis=1, keepdims=True)

    @pl.when(c == pl.num_programs(1) - 1)
    def _():
        zr = zr_ref[...].astype(jnp.float32)
        # Diagonal term of the similarity matrix for these rows: ||z_row||^2/T (~ 1/T).
        self_sim = jnp.sum(zr * zr, axis=-1, keepdims=True)
        denom = denom_ref[...] - jnp.exp(self_sim)
        # -log(exp(pos/T)/denom) = -pos/T + log(denom); pos_ref already holds pos/T.
        out_ref[...] = -pos_ref[...] + jnp.log(denom)


def _pick_tile(n: int, max_tile: int) -> int:
    """Largest multiple of 8 that divides n and is <= max_tile; else the full dim."""
    for cand in range(min(max_tile, n), 7, -1):
        if cand % 8 == 0 and n % cand == 0:
            return cand
    return n


def ntxent_loss(z_i: jax.Array, z_j: jax.Array, temperature: float = 1.0) -> jax.Array:
    assert z_i.shape == z_j.shape and z_i.ndim == 2
    n, d = z_i.shape
    n2 = 2 * n
    inv_sqrt_t = 1.0 / float(temperature) ** 0.5

    # Keep bf16 inputs in bf16 for the MXU (full rate on v6e/v7x); f32 otherwise.
    mm_dtype = jnp.bfloat16 if z_i.dtype == jnp.bfloat16 else jnp.float32

    prep = pl.pallas_call(
        functools.partial(_prep_kernel, inv_sqrt_t=inv_sqrt_t, eps=1e-8),
        out_shape=(
            jax.ShapeDtypeStruct((n, d), mm_dtype),
            jax.ShapeDtypeStruct((n, d), mm_dtype),
            jax.ShapeDtypeStruct((n, 1), jnp.float32),
        ),
        in_specs=[
            pl.BlockSpec(memory_space=pltpu.MemorySpace.VMEM),
            pl.BlockSpec(memory_space=pltpu.MemorySpace.VMEM),
        ],
        out_specs=(
            pl.BlockSpec(memory_space=pltpu.MemorySpace.VMEM),
            pl.BlockSpec(memory_space=pltpu.MemorySpace.VMEM),
            pl.BlockSpec(memory_space=pltpu.MemorySpace.VMEM),
        ),
    )
    zi_s, zj_s, pos = prep(z_i, z_j)

    # Concatenate in the wrapper (HBM layout, handled by XLA), not in-kernel.
    z_s = jnp.concatenate([zi_s, zj_s], axis=0)   # (2N, D), normalized / sqrt(T)
    pos2 = jnp.concatenate([pos, pos], axis=0)    # (2N, 1), positives / T

    tr = _pick_tile(n2, 512)     # row tile
    tc = _pick_tile(n2, 1024)    # column tile
    grid = (n2 // tr, n2 // tc)

    mm_bytes = jnp.dtype(mm_dtype).itemsize
    cost = pl.CostEstimate(
        flops=2 * n2 * n2 * d,
        transcendentals=n2 * n2 + n2,
        bytes_accessed=(grid[0] + 1) * n2 * d * mm_bytes + 3 * n2 * 4,
    )

    losses = pl.pallas_call(
        _ntxent_tiled_kernel,
        out_shape=jax.ShapeDtypeStruct((n2, 1), jnp.float32),
        grid_spec=pltpu.PrefetchScalarGridSpec(
            num_scalar_prefetch=0,
            grid=grid,
            in_specs=[
                pl.BlockSpec((tr, d), lambda r, c: (r, 0)),   # row block of scaled z
                pl.BlockSpec((tc, d), lambda r, c: (c, 0)),   # col block of scaled z
                pl.BlockSpec((tr, 1), lambda r, c: (r, 0)),   # positives / T
            ],
            out_specs=pl.BlockSpec((tr, 1), lambda r, c: (r, 0)),
            scratch_shapes=[pltpu.VMEM((tr, 1), jnp.float32)],
        ),
        compiler_params=pltpu.CompilerParams(
            dimension_semantics=("parallel", "arbitrary"),
            vmem_limit_bytes=32 * 1024 * 1024,
        ),
        cost_estimate=cost,
    )(z_s, z_s, pos2)

    return jnp.sum(losses) / n2


def _ntxent_reference(z_i, z_j, temperature=1.0):
    # Pure-JAX reference mirroring the PyTorch module.
    n = z_i.shape[0]
    z = jnp.concatenate([z_i, z_j], axis=0).astype(jnp.float32)
    norm = jnp.linalg.norm(z, axis=1, keepdims=True)
    sim = (z @ z.T) / jnp.maximum(norm * norm.T, 1e-8)
    sim_ij = jnp.diagonal(sim, offset=n)
    sim_ji = jnp.diagonal(sim, offset=-n)
    positives = jnp.concatenate([sim_ij, sim_ji], axis=0)
    mask = 1.0 - jnp.eye(2 * n, dtype=jnp.float32)
    numerator = jnp.exp(positives / temperature)
    denominator = jnp.sum(mask * jnp.exp(sim / temperature), axis=1)
    all_losses = -jnp.log(numerator / denominator)
    return jnp.sum(all_losses) / (2 * n)


if __name__ == "__main__":
    key = jax.random.PRNGKey(0)
    k1, k2 = jax.random.split(key)
    N, D = 8, 32                      # anchor/positive embeddings: (N, D)
    z_i = jax.random.normal(k1, (N, D), dtype=jnp.float32)
    z_j = jax.random.normal(k2, (N, D), dtype=jnp.float32)

    loss = ntxent_loss(z_i, z_j, temperature=1.0)
    jax.block_until_ready(loss)

    ref = _ntxent_reference(z_i, z_j, temperature=1.0)
    assert jnp.allclose(loss, ref, atol=1e-4, rtol=1e-4), (loss, ref)

    print("KERNEL_OK")
</pallas_src>

<mosaic_0001>
module attributes {stable_mosaic.version = 11 : i64} {
  func.func @_prep_kernel(%arg0: memref<8x32xf32, #tpu.memory_space<vmem>>, %arg1: memref<8x32xf32, #tpu.memory_space<vmem>>, %arg2: memref<8x32xf32, #tpu.memory_space<vmem>>, %arg3: memref<8x32xf32, #tpu.memory_space<vmem>>, %arg4: memref<8x1xf32, #tpu.memory_space<vmem>>) attributes {dimension_semantics = [], scalar_prefetch = 0 : i64, scratch_operands = 0 : i64, tpu.core_type = #tpu.core_type<tc>} {
    %c0 = arith.constant 0 : index
    %c0_0 = arith.constant 0 : index
    %0 = vector.load %arg0[%c0, %c0_0] : memref<8x32xf32, #tpu.memory_space<vmem>>, vector<8x32xf32>
    %c0_1 = arith.constant 0 : index
    %c0_2 = arith.constant 0 : index
    %1 = vector.load %arg1[%c0_1, %c0_2] : memref<8x32xf32, #tpu.memory_space<vmem>>, vector<8x32xf32>
    %2 = arith.mulf %0, %0 : vector<8x32xf32>
    %cst = arith.constant dense<0.000000e+00> : vector<8xf32>
    %3 = vector.multi_reduction <add>, %2, %cst [1] : vector<8x32xf32> to vector<8xf32>
    %4 = vector.shape_cast %3 : vector<8xf32> to vector<8x1xf32>
    %cst_3 = arith.constant 1.000000e-16 : f32
    %5 = vector.broadcast %cst_3 : f32 to vector<8x1xf32>
    %6 = arith.maximumf %4, %5 : vector<8x1xf32>
    %7 = math.rsqrt %6 : vector<8x1xf32>
    %cst_4 = arith.constant 1.000000e+00 : f32
    %8 = vector.broadcast %cst_4 : f32 to vector<8x1xf32>
    %9 = arith.mulf %8, %7 : vector<8x1xf32>
    %10 = arith.mulf %1, %1 : vector<8x32xf32>
    %cst_5 = arith.constant dense<0.000000e+00> : vector<8xf32>
    %11 = vector.multi_reduction <add>, %10, %cst_5 [1] : vector<8x32xf32> to vector<8xf32>
    %12 = vector.shape_cast %11 : vector<8xf32> to vector<8x1xf32>
    %cst_6 = arith.constant 1.000000e-16 : f32
    %13 = vector.broadcast %cst_6 : f32 to vector<8x1xf32>
    %14 = arith.maximumf %12, %13 : vector<8x1xf32>
    %15 = math.rsqrt %14 : vector<8x1xf32>
    %cst_7 = arith.constant 1.000000e+00 : f32
    %16 = vector.broadcast %cst_7 : f32 to vector<8x1xf32>
    %17 = arith.mulf %16, %15 : vector<8x1xf32>
    %18 = vector.broadcast %9 : vector<8x1xf32> to vector<8x32xf32>
    %19 = arith.mulf %0, %18 : vector<8x32xf32>
    %20 = vector.broadcast %17 : vector<8x1xf32> to vector<8x32xf32>
    %21 = arith.mulf %1, %20 : vector<8x32xf32>
    %22 = arith.mulf %19, %21 : vector<8x32xf32>
    %cst_8 = arith.constant dense<0.000000e+00> : vector<8xf32>
    %23 = vector.multi_reduction <add>, %22, %cst_8 [1] : vector<8x32xf32> to vector<8xf32>
    %24 = vector.shape_cast %23 : vector<8xf32> to vector<8x1xf32>
    %c0_9 = arith.constant 0 : index
    %c0_10 = arith.constant 0 : index
    %25 = vector.load %arg4[%c0_9, %c0_10] : memref<8x1xf32, #tpu.memory_space<vmem>>, vector<8x1xf32>
    tpu.vector_store %arg4[%c0_9, %c0_10], %24 {strides = array<i32>} : memref<8x1xf32, #tpu.memory_space<vmem>>, vector<8x1xf32>,
    %c0_11 = arith.constant 0 : index
    %c0_12 = arith.constant 0 : index
    %26 = vector.load %arg2[%c0_11, %c0_12] : memref<8x32xf32, #tpu.memory_space<vmem>>, vector<8x32xf32>
    tpu.vector_store %arg2[%c0_11, %c0_12], %19 {strides = array<i32>} : memref<8x32xf32, #tpu.memory_space<vmem>>, vector<8x32xf32>,
    %c0_13 = arith.constant 0 : index
    %c0_14 = arith.constant 0 : index
    %27 = vector.load %arg3[%c0_13, %c0_14] : memref<8x32xf32, #tpu.memory_space<vmem>>, vector<8x32xf32>
    tpu.vector_store %arg3[%c0_13, %c0_14], %21 {strides = array<i32>} : memref<8x32xf32, #tpu.memory_space<vmem>>, vector<8x32xf32>,
    return
  }
}

</mosaic_0001>

<bundles_post_ra>
// kernel: tpu_custom_call.1
= control target key start
LH: loop header
LB: loop body
LE: loop exit
PB: predicated region body
PF: predicated region fallthrough
CT: control target
= control target key end

     0   :  { %10 = vsyncpa [#allocation3], 0  ;;  %s244_s0 = inlined_call_operand.hbm [shape: f32[8,32], index: 0, kind: input, shape index: {}]   ;;  %s245_s1 = inlined_call_operand.hbm [shape: f32[8,32], index: 1, kind: input, shape index: {}]   ;;  %s246_s2 = inlined_call_operand.hbm [shape: f32[8,32], index: 2, kind: output, shape index: {0}]   ;;  %s247_s3 = inlined_call_operand.hbm [shape: f32[8,32], index: 3, kind: output, shape index: {1}]   ;;  %s248_s4 = inlined_call_operand.vmem [shape: f32[8,1], index: 4, kind: output, shape index: {2}]  }
   0x1   :  { %11 = vsyncpa [#allocation6], 0 }
   0x2   :  { %12 = vsyncpa [#allocation4], 0 }
   0x3   :  { %13 = vsyncpa [#allocation9], 0  ;;  %s195_s15 = smov [#allocation2]   ;;  %s196_s17 = smov [#allocation5]  }
   0x4   :  { %s20_s16 = sshll.u32 %s195_s15, 4  ;;  %s30_s18 = sshll.u32 %s196_s17, 4  ;;  %s21_s16 = int_to_ptr.vmem [resolvable:$true] %s20_s16  ;;  %s31_s18 = int_to_ptr.vmem [resolvable:$true] %s30_s18 }
   0x5   :  { %s115_s19 = scalar_lea.vmem %s21_s16, 128  ;;  %p120_p1 = scmp.lt.s32.totalorder %s21_s16, %s21_s16 }
   0x6   :  { %p116_p0 = scmp.ne.s32.totalorder %s21_s16, %s115_s19  ;;  %p121_p2 = scmp.lt.s32.totalorder %s115_s19, %s115_s19 }
   0x8   :  { %p122_p3 = por %p121_p2, %p120_p1 }
   0xa   :  { %p123_p4 = pnand %p122_p3, %p116_p0 }
   0xc   :  { %126 = shalt.err (!%p123_p4)
}
   0xd   :  { %23 = dma.hbm_to_vmem [thread:$0]  %s244_s0, 128, %s21_s16, [#allocation3]  }
   0xe   :  { %s135_s22 = scalar_lea.vmem %s31_s18, 128  ;;  %p140_p6 = scmp.lt.s32.totalorder %s31_s18, %s31_s18 }
   0xf   :  { %p136_p5 = scmp.ne.s32.totalorder %s31_s18, %s135_s22  ;;  %p141_p7 = scmp.lt.s32.totalorder %s135_s22, %s135_s22 }
  0x11   :  { %p142_p8 = por %p141_p7, %p140_p6 }
  0x13   :  { %p143_p9 = pnand %p142_p8, %p136_p5 }
  0x15   :  { %146 = shalt.err (!%p143_p9)
}
  0x16   :  { %33 = dma.hbm_to_vmem [thread:$0]  %s245_s1, 128, %s31_s18, [#allocation6]  }
  0x17   :  { %187 = dma.done.wait [#allocation3], 128  }
  0x18   :  { %188 = vsyncadd [#allocation3], 4294967168 }
  0x19   :  { %189 = dma.done.wait [#allocation6], 128  }
  0x1a   :  { %190 = vsyncadd [#allocation6], 4294967168  ;;  %v40_v0 = vld [vmem:[#allocation2] sm:$0xff]  ;;  %vm43_vm0 = vcmask 261120   ;;  %v41_v1 = vld [vmem:[#allocation5] sm:$0xff]  ;;  %s197_s0 = smov [#allocation7]  }
  0x1b   :  { %v42_v2 = vmul.f32 %v40_v0, %v40_v0  ;;  %v49_v3 = vmul.f32 %v41_v1, %v41_v1  ;;  %s71_s1 = sshll.u32 %s197_s0, 4  ;;  %s198_s25 = smov [#allocation8]   ;;  %s72_s1 = int_to_ptr.vmem [resolvable:$true] %s71_s1 }
  0x1c   :  { %s81_s26 = sshll.u32 %s198_s25, 4  ;;  %s147_s27 = scalar_lea.vmem %s72_s1, 128  ;;  %s82_s26 = int_to_ptr.vmem [resolvable:$true] %s81_s26 }
  0x1d   :  { %v44_v4 = vsel %vm43_vm0, %v42_v2, 0.0  ;;  %v50_v5 = vsel %vm43_vm0, %v49_v3, 0.0  ;;  %p148_p10 = scmp.ne.s32.totalorder %s72_s1, %s147_s27  ;;  %p152_p11 = scmp.lt.s32.totalorder %s72_s1, %s72_s1 }
  0x1e   :  { %45 = vadd.xlane.f32.xlu0 %v44_v4  ;;  %p153_p12 = scmp.lt.s32.totalorder %s147_s27, %s147_s27 }
  0x20   :  { %p154_p13 = por %p153_p12, %p152_p11 }
  0x22   :  { %51 = vadd.xlane.f32.xlu0 %v50_v5  ;;  %p155_p0 = pnand %p154_p13, %p148_p10 }
  0xa7   :  { %v46_v6 = vpop.xlane.xlu0 %45 }
  0xa8   :  { %v47_v7 = vmax.f32 %v46_v6, 1e-16 }
  0xaa   :  { %103 = vrsqrt.f32 %v47_v7 }
  0xab   :  { %v52_v8 = vpop.xlane.xlu0 %51 }
  0xac   :  { %v53_v9 = vmax.f32 %v52_v8, 1e-16 }
  0xae   :  { %105 = vrsqrt.f32 %v53_v9 }
  0xb7   :  { %v104_v10 = vpop.eup %103 }
  0xb8   :  { %v55_v11 = vmul.f32 %v104_v10, %v40_v0 }
  0xba   :  { %63 = vst.msk [vmem:[#allocation7] sm:$0xff] %vm43_vm0, %v55_v11 }
  0xbb   :  { %v106_v12 = vpop.eup %105 }
  0xbc   :  { %v56_v13 = vmul.f32 %v106_v12, %v41_v1 }
  0xbe   :  { %v57_v14 = vmul.f32 %v56_v13, %v55_v11  ;;  %64 = vst.msk [vmem:[#allocation8] sm:$0xff] %vm43_vm0, %v56_v13 }
  0xc0   :  { %v58_v15 = vsel %vm43_vm0, %v57_v14, 0.0 }
  0xc1   :  { %59 = vadd.xlane.f32.xlu1 %v58_v15 }
  0xc2   :  { %158 = shalt.err (!%p155_p0)
}
  0xc3   :  { %74 = dma.vmem_to_hbm [thread:$0]  %s72_s1, 128, %s246_s2, [#allocation4]  }
  0xc4   :  { %s167_s30 = scalar_lea.vmem %s82_s26, 128  ;;  %p172_p2 = scmp.lt.s32.totalorder %s82_s26, %s82_s26 }
  0xc5   :  { %p168_p1 = scmp.ne.s32.totalorder %s82_s26, %s167_s30  ;;  %p173_p3 = scmp.lt.s32.totalorder %s167_s30, %s167_s30 }
  0xc7   :  { %p174_p4 = por %p173_p3, %p172_p2 }
  0xc9   :  { %p175_p5 = pnand %p174_p4, %p168_p1 }
  0xcb   :  { %178 = shalt.err (!%p175_p5)
}
  0xcc   :  { %84 = dma.vmem_to_hbm [thread:$0]  %s82_s26, 128, %s247_s3, [#allocation9]   ;;  %vm61_vm1 = vcmask 7168  }
 0x14a   :  { %v60_v16 = vpop.xlane.xlu1 %59 }
 0x14b   :  { %62 = vst.msk [vmem:[%s248_s4] sm:$0xff] %vm61_vm1, %v60_v16 }
 0x14c   :  { %191 = dma.done.wait [#allocation4], 128  }
 0x14d   :  { %192 = vsyncadd [#allocation4], 4294967168 }
 0x14e   :  { %193 = dma.done.wait [#allocation9], 128  }
 0x14f   :  { %194 = vsyncadd [#allocation9], 4294967168 }
 0x150   :  { %95 = vsyncpa [#allocation3], 1 }
 0x151   :  { %96 = vsyncpa [#allocation6], 1 }
 0x152   :  { %97 = vsyncpa [#allocation4], 1 }
 0x153   :  { %98 = vsyncpa [#allocation9], 1 }

</bundles_post_ra>
